<compile_context>
chip_gen: v6e
topology: v6e:2x2x1
jax: 0.10.0
libtpu: 0.0.40
codegen_flags: <defaults>
</compile_context>

<pallas_src>
import jax
import jax.numpy as jnp
from jax.experimental import pallas as pl
from jax.experimental.pallas import tpu as pltpu

HIDDEN_DIM = 10     # LSTM input & hidden size
OUTPUT_DIM = 8      # Linear output size
LANE = 128          # TPU vreg lane width
GSLOT = 32          # packed gate slot width (H = 10 <= 32); gate k at lanes [k*32, k*32+H)
SUBLANE = 8         # f32 sublane count; batch padded to a multiple of this


def _decoder_rnn_kernel(x_ref, w_ih_ref, w_hh_ref, b_ref, h0_ref, c0_ref,
                        w_out_ref, b_out_ref,
                        out_ref, hn_ref, cn_ref):
    """Whole forward pass in one kernel invocation (all operands fit VMEM).

    x_ref     : (T*BP, H)      flattened timesteps, batch padded to BP (mult of 8)
    w_ih_ref  : (H, LANE)      pre-transposed; gate k packed at lanes [k*32, k*32+H)
    w_hh_ref  : (GSLOT, LANE)  pre-transposed, rows >= H zero, packed gate columns
    b_ref     : (1, LANE)      combined b_ih + b_hh, packed gate layout
    h0_ref    : (BP, GSLOT)    lane-padded initial hidden state
    c0_ref    : (BP, GSLOT)    lane-padded initial cell state
    w_out_ref : (GSLOT, LANE)  pre-transposed, padded Linear weight
    b_out_ref : (1, LANE)      padded Linear bias
    out_ref   : (BP, LANE)     Linear(h at t=0); valid [:B, :OUTPUT_DIM]
    hn_ref    : (BP, GSLOT)    final h; valid [:B, :HIDDEN_DIM]
    cn_ref    : (BP, GSLOT)    final c; valid [:B, :HIDDEN_DIM]
    """
    BP = h0_ref.shape[0]
    T = x_ref.shape[0] // BP

    # Packed recurrence weight is GSLOT*LANE*4 = 16 KiB (4 vregs), so holding
    # it for the whole unrolled loop is cheap (it was 256 KiB before packing).
    w_hh = w_hh_ref[...]

    # One MXU pass for every timestep's input projection, bias folded in.
    # Off the serial recurrence path; padded gate lanes come out exactly 0.
    gates_x = (jnp.dot(x_ref[...], w_ih_ref[...],
                       preferred_element_type=jnp.float32)
               + b_ref[...])                                   # (T*BP, LANE)

    def cell(gx_t, h, c):
        # Per-step MXU op: (BP, 32) @ (32, 128) -> 32-row weight push and a
        # single 128-lane column tile on every TPU generation.
        # TODO(synk): stage w_hh once with pltpu.matmul_push_rhs/matmul_acc_lhs
        # to remove the per-step weight push entirely.
        gates = jnp.dot(h, w_hh, preferred_element_type=jnp.float32) + gx_t
        # Two EUP passes per step: one tanh yields all three sigmoids via the
        # identity sigmoid(x) = 0.5*tanh(0.5*x) + 0.5; one more gives g's tanh.
        sig = 0.5 * jnp.tanh(0.5 * gates) + 0.5
        tnh = jnp.tanh(gates)
        i = sig[:, 0 * GSLOT:1 * GSLOT]    # aligned slot -> free vreg select
        f = sig[:, 1 * GSLOT:2 * GSLOT]    # unaligned -> XLU lane rotate (idle slot)
        g = tnh[:, 2 * GSLOT:3 * GSLOT]
        o = sig[:, 3 * GSLOT:4 * GSLOT]
        # Padded lanes (>= H): gates == 0 -> i=f=o=0.5, g=0, and c starts at 0
        # there, so padded lanes of h/c stay exactly 0 for every step.
        c_new = f * c + i * g
        h_new = o * jnp.tanh(c_new)
        return h_new, c_new

    # Peel timestep 0: PyTorch forward uses output[0] (= h after first step).
    h, c = cell(gates_x[0:BP, :], h0_ref[...], c0_ref[...])
    h_t0 = h                                   # small (BP, GSLOT) live value
    # Remaining steps fully unrolled (T is a compile-time constant). BP is a
    # multiple of 8, so each slice is a whole-sublane-tile select (no relayout).
    for t in range(1, T):
        h, c = cell(gates_x[t * BP:(t + 1) * BP, :], h, c)

    # Output Linear AFTER the recurrence: the MXU is idle here, so the w_out
    # weight load never contends with the serial w_hh recurrence matmuls.
    out_ref[...] = (jnp.dot(h_t0, w_out_ref[...],
                            preferred_element_type=jnp.float32)
                    + b_out_ref[...])
    hn_ref[...] = h
    cn_ref[...] = c


def prepare_decoder_params(params):
    """One-time weight prep (transpose + gate packing + padding).

    Hoisted out of the per-call path: call once and reuse the result for every
    decode step / forward call.
    """
    w_ih, w_hh, b_ih, b_hh, w_out, b_out = params
    H = HIDDEN_DIM

    def pack_gates(m_t, rows_out):
        # m_t: (rows, 4H) with PyTorch gate order (i, f, g, o) on the last axis
        # -> (rows_out, LANE) with gate k at lanes [k*GSLOT, k*GSLOT + H),
        # zeros elsewhere (rows >= rows are zero-padded too).
        rows = m_t.shape[0]
        out = jnp.zeros((rows_out, LANE), jnp.float32)
        for k in range(4):
            out = out.at[:rows, k * GSLOT:k * GSLOT + H].set(
                m_t[:, k * H:(k + 1) * H].astype(jnp.float32))
        return out

    w_ih_p = pack_gates(w_ih.T, H)                                # (H, LANE)
    w_hh_p = pack_gates(w_hh.T, GSLOT)                            # (GSLOT, LANE)
    b_p = pack_gates((b_ih + b_hh).reshape(1, 4 * H), 1)          # (1, LANE)
    w_out_p = jnp.zeros((GSLOT, LANE), jnp.float32).at[:H, :OUTPUT_DIM].set(
        w_out.T.astype(jnp.float32))                              # (GSLOT, LANE)
    b_out_p = jnp.zeros((1, LANE), jnp.float32).at[:, :OUTPUT_DIM].set(
        b_out.astype(jnp.float32).reshape(1, OUTPUT_DIM))         # (1, LANE)
    return (w_ih_p, w_hh_p, b_p, w_out_p, b_out_p)


@jax.jit
def decoder_rnn_forward(x, hidden, prepped):
    """Mirrors DecoderRNN.forward(input, hidden). `prepped` = prepare_decoder_params(...)."""
    w_ih_p, w_hh_p, b_p, w_out_p, b_out_p = prepped
    h0, c0 = hidden                      # each (1, B, H)
    T, B, H = x.shape
    assert H == HIDDEN_DIM
    assert T >= 1, "LSTM requires at least one timestep (matches PyTorch)"
    BP = ((B + SUBLANE - 1) // SUBLANE) * SUBLANE   # batch padded to sublane multiple

    x_p = jnp.pad(x.astype(jnp.float32), ((0, 0), (0, BP - B), (0, 0)))
    x2d = x_p.reshape(T * BP, H)
    h0_p = jnp.pad(h0[0].astype(jnp.float32), ((0, BP - B), (0, GSLOT - H)))
    c0_p = jnp.pad(c0[0].astype(jnp.float32), ((0, BP - B), (0, GSLOT - H)))

    vmem = pl.BlockSpec(memory_space=pltpu.MemorySpace.VMEM)
    out_p, hn_p, cn_p = pl.pallas_call(
        _decoder_rnn_kernel,
        out_shape=(
            jax.ShapeDtypeStruct((BP, LANE), jnp.float32),
            jax.ShapeDtypeStruct((BP, GSLOT), jnp.float32),
            jax.ShapeDtypeStruct((BP, GSLOT), jnp.float32),
        ),
        in_specs=[vmem] * 8,
        out_specs=(vmem, vmem, vmem),
    )(x2d, w_ih_p, w_hh_p, b_p, h0_p, c0_p, w_out_p, b_out_p)

    # TODO(synk): for large batch on v7x, add a leading batch grid axis with
    # dimension_semantics=("parallel",) so both TensorCores split the batch;
    # keep the grid-less form for B <= 8 (grid steps would only add overhead).
    out = out_p[:B, :OUTPUT_DIM]
    h_n = hn_p[:B, :H][None]
    c_n = cn_p[:B, :H][None]
    return out, (h_n, c_n)


def _reference_forward(x, hidden, params):
    """Pure-JAX reference with identical (PyTorch LSTM) semantics."""
    h0, c0 = hidden
    w_ih, w_hh, b_ih, b_hh, w_out, b_out = params
    H = HIDDEN_DIM
    h, c = h0[0], c0[0]
    outputs = []
    for t in range(x.shape[0]):
        gates = x[t] @ w_ih.T + b_ih + h @ w_hh.T + b_hh
        i = jax.nn.sigmoid(gates[:, 0 * H:1 * H])
        f = jax.nn.sigmoid(gates[:, 1 * H:2 * H])
        g = jnp.tanh(gates[:, 2 * H:3 * H])
        o = jax.nn.sigmoid(gates[:, 3 * H:4 * H])
        c = f * c + i * g
        h = o * jnp.tanh(c)
        outputs.append(h)
    out = outputs[0] @ w_out.T + b_out
    return out, (h[None], c[None])


def init_params(key, hidden_dim=HIDDEN_DIM, output_dim=OUTPUT_DIM):
    """Deterministic init matching PyTorch shapes (uniform +/- 1/sqrt(H))."""
    k = jax.random.split(key, 6)
    bound = 1.0 / jnp.sqrt(hidden_dim)
    w_ih = jax.random.uniform(k[0], (4 * hidden_dim, hidden_dim),
                              jnp.float32, -bound, bound)
    w_hh = jax.random.uniform(k[1], (4 * hidden_dim, hidden_dim),
                              jnp.float32, -bound, bound)
    b_ih = jax.random.uniform(k[2], (4 * hidden_dim,), jnp.float32, -bound, bound)
    b_hh = jax.random.uniform(k[3], (4 * hidden_dim,), jnp.float32, -bound, bound)
    w_out = jax.random.uniform(k[4], (output_dim, hidden_dim),
                               jnp.float32, -bound, bound)
    b_out = jax.random.uniform(k[5], (output_dim,), jnp.float32, -bound, bound)
    return (w_ih, w_hh, b_ih, b_hh, w_out, b_out)


if __name__ == "__main__":
    key = jax.random.PRNGKey(0)
    k_params, k_x, k_h, k_c = jax.random.split(key, 4)

    T, B = 8, 2  # seq_len=8, batch=2
    params = init_params(k_params)
    x = jax.random.normal(k_x, (T, B, HIDDEN_DIM), jnp.float32)
    h0 = jax.random.normal(k_h, (1, B, HIDDEN_DIM), jnp.float32)
    c0 = jax.random.normal(k_c, (1, B, HIDDEN_DIM), jnp.float32)

    # Weight prep is hoisted out of the per-call path: done once, reused.
    prepped = prepare_decoder_params(params)
    prepped = jax.block_until_ready(prepped)

    out, (h_n, c_n) = decoder_rnn_forward(x, (h0, c0), prepped)
    out = jax.block_until_ready(out)
    h_n = jax.block_until_ready(h_n)
    c_n = jax.block_until_ready(c_n)

    # Correctness check against pure-JAX reference (all math kept in f32, so
    # the tight tolerance is preserved).
    out_ref, (h_ref, c_ref) = _reference_forward(x, (h0, c0), params)
    assert out.shape == (B, OUTPUT_DIM)
    assert h_n.shape == (1, B, HIDDEN_DIM) and c_n.shape == (1, B, HIDDEN_DIM)
    assert jnp.allclose(out, out_ref, atol=1e-5), "linear output mismatch"
    assert jnp.allclose(h_n, h_ref, atol=1e-5), "h_n mismatch"
    assert jnp.allclose(c_n, c_ref, atol=1e-5), "c_n mismatch"

    print("KERNEL_OK")
</pallas_src>

<mosaic_0001>
module attributes {stable_mosaic.version = 11 : i64} {
  func.func @_decoder_rnn_kernel(%arg0: memref<64x10xf32, #tpu.memory_space<vmem>>, %arg1: memref<10x128xf32, #tpu.memory_space<vmem>>, %arg2: memref<32x128xf32, #tpu.memory_space<vmem>>, %arg3: memref<1x128xf32, #tpu.memory_space<vmem>>, %arg4: memref<8x32xf32, #tpu.memory_space<vmem>>, %arg5: memref<8x32xf32, #tpu.memory_space<vmem>>, %arg6: memref<32x128xf32, #tpu.memory_space<vmem>>, %arg7: memref<1x128xf32, #tpu.memory_space<vmem>>, %arg8: memref<8x128xf32, #tpu.memory_space<vmem>>, %arg9: memref<8x32xf32, #tpu.memory_space<vmem>>, %arg10: memref<8x32xf32, #tpu.memory_space<vmem>>) attributes {dimension_semantics = [], scalar_prefetch = 0 : i64, scratch_operands = 0 : i64, tpu.core_type = #tpu.core_type<tc>} {
    %c0 = arith.constant 0 : index
    %c0_0 = arith.constant 0 : index
    %0 = vector.load %arg2[%c0, %c0_0] : memref<32x128xf32, #tpu.memory_space<vmem>>, vector<32x128xf32>
    %c0_1 = arith.constant 0 : index
    %c0_2 = arith.constant 0 : index
    %1 = vector.load %arg0[%c0_1, %c0_2] : memref<64x10xf32, #tpu.memory_space<vmem>>, vector<64x10xf32>
    %c0_3 = arith.constant 0 : index
    %c0_4 = arith.constant 0 : index
    %2 = vector.load %arg1[%c0_3, %c0_4] : memref<10x128xf32, #tpu.memory_space<vmem>>, vector<10x128xf32>
    %cst = arith.constant dense<0.000000e+00> : vector<64x128xf32>
    %3 = tpu.matmul %1, %2, %cst {dimension_numbers = #tpu.dot_dimension_numbers<[1], [0], [0], [1], [0, 0, 1, 1], [], []>} : vector<64x10xf32>, vector<10x128xf32>, vector<64x128xf32> -> vector<64x128xf32>
    %c0_5 = arith.constant 0 : index
    %c0_6 = arith.constant 0 : index
    %4 = vector.load %arg3[%c0_5, %c0_6] : memref<1x128xf32, #tpu.memory_space<vmem>>, vector<1x128xf32>
    %5 = vector.broadcast %4 : vector<1x128xf32> to vector<64x128xf32>
    %6 = arith.addf %3, %5 : vector<64x128xf32>
    %7 = vector.extract_strided_slice %6 {offsets = [0, 0], sizes = [8, 128], strides = [1, 1]} : vector<64x128xf32> to vector<8x128xf32>
    %c0_7 = arith.constant 0 : index
    %c0_8 = arith.constant 0 : index
    %8 = vector.load %arg4[%c0_7, %c0_8] : memref<8x32xf32, #tpu.memory_space<vmem>>, vector<8x32xf32>
    %c0_9 = arith.constant 0 : index
    %c0_10 = arith.constant 0 : index
    %9 = vector.load %arg5[%c0_9, %c0_10] : memref<8x32xf32, #tpu.memory_space<vmem>>, vector<8x32xf32>
    %cst_11 = arith.constant dense<0.000000e+00> : vector<8x128xf32>
    %10 = tpu.matmul %8, %0, %cst_11 {dimension_numbers = #tpu.dot_dimension_numbers<[1], [0], [0], [1], [0, 0, 1, 1], [], []>} : vector<8x32xf32>, vector<32x128xf32>, vector<8x128xf32> -> vector<8x128xf32>
    %11 = arith.addf %10, %7 : vector<8x128xf32>
    %cst_12 = arith.constant 5.000000e-01 : f32
    %12 = vector.broadcast %cst_12 : f32 to vector<8x128xf32>
    %13 = arith.mulf %12, %11 : vector<8x128xf32>
    %14 = math.tanh %13 : vector<8x128xf32>
    %cst_13 = arith.constant 5.000000e-01 : f32
    %15 = vector.broadcast %cst_13 : f32 to vector<8x128xf32>
    %16 = arith.mulf %15, %14 : vector<8x128xf32>
    %cst_14 = arith.constant 5.000000e-01 : f32
    %17 = vector.broadcast %cst_14 : f32 to vector<8x128xf32>
    %18 = arith.addf %16, %17 : vector<8x128xf32>
    %19 = math.tanh %11 : vector<8x128xf32>
    %20 = vector.extract_strided_slice %18 {offsets = [0, 0], sizes = [8, 32], strides = [1, 1]} : vector<8x128xf32> to vector<8x32xf32>
    %21 = vector.extract_strided_slice %18 {offsets = [0, 32], sizes = [8, 32], strides = [1, 1]} : vector<8x128xf32> to vector<8x32xf32>
    %22 = vector.extract_strided_slice %19 {offsets = [0, 64], sizes = [8, 32], strides = [1, 1]} : vector<8x128xf32> to vector<8x32xf32>
    %23 = vector.extract_strided_slice %18 {offsets = [0, 96], sizes = [8, 32], strides = [1, 1]} : vector<8x128xf32> to vector<8x32xf32>
    %24 = arith.mulf %21, %9 : vector<8x32xf32>
    %25 = arith.mulf %20, %22 : vector<8x32xf32>
    %26 = arith.addf %24, %25 : vector<8x32xf32>
    %27 = math.tanh %26 : vector<8x32xf32>
    %28 = arith.mulf %23, %27 : vector<8x32xf32>
    %29 = vector.extract_strided_slice %6 {offsets = [8, 0], sizes = [8, 128], strides = [1, 1]} : vector<64x128xf32> to vector<8x128xf32>
    %cst_15 = arith.constant dense<0.000000e+00> : vector<8x128xf32>
    %30 = tpu.matmul %28, %0, %cst_15 {dimension_numbers = #tpu.dot_dimension_numbers<[1], [0], [0], [1], [0, 0, 1, 1], [], []>} : vector<8x32xf32>, vector<32x128xf32>, vector<8x128xf32> -> vector<8x128xf32>
    %31 = arith.addf %30, %29 : vector<8x128xf32>
    %cst_16 = arith.constant 5.000000e-01 : f32
    %32 = vector.broadcast %cst_16 : f32 to vector<8x128xf32>
    %33 = arith.mulf %32, %31 : vector<8x128xf32>
    %34 = math.tanh %33 : vector<8x128xf32>
    %cst_17 = arith.constant 5.000000e-01 : f32
    %35 = vector.broadcast %cst_17 : f32 to vector<8x128xf32>
    %36 = arith.mulf %35, %34 : vector<8x128xf32>
    %cst_18 = arith.constant 5.000000e-01 : f32
    %37 = vector.broadcast %cst_18 : f32 to vector<8x128xf32>
    %38 = arith.addf %36, %37 : vector<8x128xf32>
    %39 = math.tanh %31 : vector<8x128xf32>
    %40 = vector.extract_strided_slice %38 {offsets = [0, 0], sizes = [8, 32], strides = [1, 1]} : vector<8x128xf32> to vector<8x32xf32>
    %41 = vector.extract_strided_slice %38 {offsets = [0, 32], sizes = [8, 32], strides = [1, 1]} : vector<8x128xf32> to vector<8x32xf32>
    %42 = vector.extract_strided_slice %39 {offsets = [0, 64], sizes = [8, 32], strides = [1, 1]} : vector<8x128xf32> to vector<8x32xf32>
    %43 = vector.extract_strided_slice %38 {offsets = [0, 96], sizes = [8, 32], strides = [1, 1]} : vector<8x128xf32> to vector<8x32xf32>
    %44 = arith.mulf %41, %26 : vector<8x32xf32>
    %45 = arith.mulf %40, %42 : vector<8x32xf32>
    %46 = arith.addf %44, %45 : vector<8x32xf32>
    %47 = math.tanh %46 : vector<8x32xf32>
    %48 = arith.mulf %43, %47 : vector<8x32xf32>
    %49 = vector.extract_strided_slice %6 {offsets = [16, 0], sizes = [8, 128], strides = [1, 1]} : vector<64x128xf32> to vector<8x128xf32>
    %cst_19 = arith.constant dense<0.000000e+00> : vector<8x128xf32>
    %50 = tpu.matmul %48, %0, %cst_19 {dimension_numbers = #tpu.dot_dimension_numbers<[1], [0], [0], [1], [0, 0, 1, 1], [], []>} : vector<8x32xf32>, vector<32x128xf32>, vector<8x128xf32> -> vector<8x128xf32>
    %51 = arith.addf %50, %49 : vector<8x128xf32>
    %cst_20 = arith.constant 5.000000e-01 : f32
    %52 = vector.broadcast %cst_20 : f32 to vector<8x128xf32>
    %53 = arith.mulf %52, %51 : vector<8x128xf32>
    %54 = math.tanh %53 : vector<8x128xf32>
    %cst_21 = arith.constant 5.000000e-01 : f32
    %55 = vector.broadcast %cst_21 : f32 to vector<8x128xf32>
    %56 = arith.mulf %55, %54 : vector<8x128xf32>
    %cst_22 = arith.constant 5.000000e-01 : f32
    %57 = vector.broadcast %cst_22 : f32 to vector<8x128xf32>
    %58 = arith.addf %56, %57 : vector<8x128xf32>
    %59 = math.tanh %51 : vector<8x128xf32>
    %60 = vector.extract_strided_slice %58 {offsets = [0, 0], sizes = [8, 32], strides = [1, 1]} : vector<8x128xf32> to vector<8x32xf32>
    %61 = vector.extract_strided_slice %58 {offsets = [0, 32], sizes = [8, 32], strides = [1, 1]} : vector<8x128xf32> to vector<8x32xf32>
    %62 = vector.extract_strided_slice %59 {offsets = [0, 64], sizes = [8, 32], strides = [1, 1]} : vector<8x128xf32> to vector<8x32xf32>
    %63 = vector.extract_strided_slice %58 {offsets = [0, 96], sizes = [8, 32], strides = [1, 1]} : vector<8x128xf32> to vector<8x32xf32>
    %64 = arith.mulf %61, %46 : vector<8x32xf32>
    %65 = arith.mulf %60, %62 : vector<8x32xf32>
    %66 = arith.addf %64, %65 : vector<8x32xf32>
    %67 = math.tanh %66 : vector<8x32xf32>
    %68 = arith.mulf %63, %67 : vector<8x32xf32>
    %69 = vector.extract_strided_slice %6 {offsets = [24, 0], sizes = [8, 128], strides = [1, 1]} : vector<64x128xf32> to vector<8x128xf32>
    %cst_23 = arith.constant dense<0.000000e+00> : vector<8x128xf32>
    %70 = tpu.matmul %68, %0, %cst_23 {dimension_numbers = #tpu.dot_dimension_numbers<[1], [0], [0], [1], [0, 0, 1, 1], [], []>} : vector<8x32xf32>, vector<32x128xf32>, vector<8x128xf32> -> vector<8x128xf32>
    %71 = arith.addf %70, %69 : vector<8x128xf32>
    %cst_24 = arith.constant 5.000000e-01 : f32
    %72 = vector.broadcast %cst_24 : f32 to vector<8x128xf32>
    %73 = arith.mulf %72, %71 : vector<8x128xf32>
    %74 = math.tanh %73 : vector<8x128xf32>
    %cst_25 = arith.constant 5.000000e-01 : f32
    %75 = vector.broadcast %cst_25 : f32 to vector<8x128xf32>
    %76 = arith.mulf %75, %74 : vector<8x128xf32>
    %cst_26 = arith.constant 5.000000e-01 : f32
    %77 = vector.broadcast %cst_26 : f32 to vector<8x128xf32>
    %78 = arith.addf %76, %77 : vector<8x128xf32>
    %79 = math.tanh %71 : vector<8x128xf32>
    %80 = vector.extract_strided_slice %78 {offsets = [0, 0], sizes = [8, 32], strides = [1, 1]} : vector<8x128xf32> to vector<8x32xf32>
    %81 = vector.extract_strided_slice %78 {offsets = [0, 32], sizes = [8, 32], strides = [1, 1]} : vector<8x128xf32> to vector<8x32xf32>
    %82 = vector.extract_strided_slice %79 {offsets = [0, 64], sizes = [8, 32], strides = [1, 1]} : vector<8x128xf32> to vector<8x32xf32>
    %83 = vector.extract_strided_slice %78 {offsets = [0, 96], sizes = [8, 32], strides = [1, 1]} : vector<8x128xf32> to vector<8x32xf32>
    %84 = arith.mulf %81, %66 : vector<8x32xf32>
    %85 = arith.mulf %80, %82 : vector<8x32xf32>
    %86 = arith.addf %84, %85 : vector<8x32xf32>
    %87 = math.tanh %86 : vector<8x32xf32>
    %88 = arith.mulf %83, %87 : vector<8x32xf32>
    %89 = vector.extract_strided_slice %6 {offsets = [32, 0], sizes = [8, 128], strides = [1, 1]} : vector<64x128xf32> to vector<8x128xf32>
    %cst_27 = arith.constant dense<0.000000e+00> : vector<8x128xf32>
    %90 = tpu.matmul %88, %0, %cst_27 {dimension_numbers = #tpu.dot_dimension_numbers<[1], [0], [0], [1], [0, 0, 1, 1], [], []>} : vector<8x32xf32>, vector<32x128xf32>, vector<8x128xf32> -> vector<8x128xf32>
    %91 = arith.addf %90, %89 : vector<8x128xf32>
    %cst_28 = arith.constant 5.000000e-01 : f32
    %92 = vector.broadcast %cst_28 : f32 to vector<8x128xf32>
    %93 = arith.mulf %92, %91 : vector<8x128xf32>
    %94 = math.tanh %93 : vector<8x128xf32>
    %cst_29 = arith.constant 5.000000e-01 : f32
    %95 = vector.broadcast %cst_29 : f32 to vector<8x128xf32>
    %96 = arith.mulf %95, %94 : vector<8x128xf32>
    %cst_30 = arith.constant 5.000000e-01 : f32
    %97 = vector.broadcast %cst_30 : f32 to vector<8x128xf32>
    %98 = arith.addf %96, %97 : vector<8x128xf32>
    %99 = math.tanh %91 : vector<8x128xf32>
    %100 = vector.extract_strided_slice %98 {offsets = [0, 0], sizes = [8, 32], strides = [1, 1]} : vector<8x128xf32> to vector<8x32xf32>
    %101 = vector.extract_strided_slice %98 {offsets = [0, 32], sizes = [8, 32], strides = [1, 1]} : vector<8x128xf32> to vector<8x32xf32>
    %102 = vector.extract_strided_slice %99 {offsets = [0, 64], sizes = [8, 32], strides = [1, 1]} : vector<8x128xf32> to vector<8x32xf32>
    %103 = vector.extract_strided_slice %98 {offsets = [0, 96], sizes = [8, 32], strides = [1, 1]} : vector<8x128xf32> to vector<8x32xf32>
    %104 = arith.mulf %101, %86 : vector<8x32xf32>
    %105 = arith.mulf %100, %102 : vector<8x32xf32>
    %106 = arith.addf %104, %105 : vector<8x32xf32>
    %107 = math.tanh %106 : vector<8x32xf32>
    %108 = arith.mulf %103, %107 : vector<8x32xf32>
    %109 = vector.extract_strided_slice %6 {offsets = [40, 0], sizes = [8, 128], strides = [1, 1]} : vector<64x128xf32> to vector<8x128xf32>
    %cst_31 = arith.constant dense<0.000000e+00> : vector<8x128xf32>
    %110 = tpu.matmul %108, %0, %cst_31 {dimension_numbers = #tpu.dot_dimension_numbers<[1], [0], [0], [1], [0, 0, 1, 1], [], []>} : vector<8x32xf32>, vector<32x128xf32>, vector<8x128xf32> -> vector<8x128xf32>
    %111 = arith.addf %110, %109 : vector<8x128xf32>
    %cst_32 = arith.constant 5.000000e-01 : f32
    %112 = vector.broadcast %cst_32 : f32 to vector<8x128xf32>
    %113 = arith.mulf %112, %111 : vector<8x128xf32>
    %114 = math.tanh %113 : vector<8x128xf32>
    %cst_33 = arith.constant 5.000000e-01 : f32
    %115 = vector.broadcast %cst_33 : f32 to vector<8x128xf32>
    %116 = arith.mulf %115, %114 : vector<8x128xf32>
    %cst_34 = arith.constant 5.000000e-01 : f32
    %117 = vector.broadcast %cst_34 : f32 to vector<8x128xf32>
    %118 = arith.addf %116, %117 : vector<8x128xf32>
    %119 = math.tanh %111 : vector<8x128xf32>
    %120 = vector.extract_strided_slice %118 {offsets = [0, 0], sizes = [8, 32], strides = [1, 1]} : vector<8x128xf32> to vector<8x32xf32>
    %121 = vector.extract_strided_slice %118 {offsets = [0, 32], sizes = [8, 32], strides = [1, 1]} : vector<8x128xf32> to vector<8x32xf32>
    %122 = vector.extract_strided_slice %119 {offsets = [0, 64], sizes = [8, 32], strides = [1, 1]} : vector<8x128xf32> to vector<8x32xf32>
    %123 = vector.extract_strided_slice %118 {offsets = [0, 96], sizes = [8, 32], strides = [1, 1]} : vector<8x128xf32> to vector<8x32xf32>
    %124 = arith.mulf %121, %106 : vector<8x32xf32>
    %125 = arith.mulf %120, %122 : vector<8x32xf32>
    %126 = arith.addf %124, %125 : vector<8x32xf32>
    %127 = math.tanh %126 : vector<8x32xf32>
    %128 = arith.mulf %123, %127 : vector<8x32xf32>
    %129 = vector.extract_strided_slice %6 {offsets = [48, 0], sizes = [8, 128], strides = [1, 1]} : vector<64x128xf32> to vector<8x128xf32>
    %cst_35 = arith.constant dense<0.000000e+00> : vector<8x128xf32>
    %130 = tpu.matmul %128, %0, %cst_35 {dimension_numbers = #tpu.dot_dimension_numbers<[1], [0], [0], [1], [0, 0, 1, 1], [], []>} : vector<8x32xf32>, vector<32x128xf32>, vector<8x128xf32> -> vector<8x128xf32>
    %131 = arith.addf %130, %129 : vector<8x128xf32>
    %cst_36 = arith.constant 5.000000e-01 : f32
    %132 = vector.broadcast %cst_36 : f32 to vector<8x128xf32>
    %133 = arith.mulf %132, %131 : vector<8x128xf32>
    %134 = math.tanh %133 : vector<8x128xf32>
    %cst_37 = arith.constant 5.000000e-01 : f32
    %135 = vector.broadcast %cst_37 : f32 to vector<8x128xf32>
    %136 = arith.mulf %135, %134 : vector<8x128xf32>
    %cst_38 = arith.constant 5.000000e-01 : f32
    %137 = vector.broadcast %cst_38 : f32 to vector<8x128xf32>
    %138 = arith.addf %136, %137 : vector<8x128xf32>
    %139 = math.tanh %131 : vector<8x128xf32>
    %140 = vector.extract_strided_slice %138 {offsets = [0, 0], sizes = [8, 32], strides = [1, 1]} : vector<8x128xf32> to vector<8x32xf32>
    %141 = vector.extract_strided_slice %138 {offsets = [0, 32], sizes = [8, 32], strides = [1, 1]} : vector<8x128xf32> to vector<8x32xf32>
    %142 = vector.extract_strided_slice %139 {offsets = [0, 64], sizes = [8, 32], strides = [1, 1]} : vector<8x128xf32> to vector<8x32xf32>
    %143 = vector.extract_strided_slice %138 {offsets = [0, 96], sizes = [8, 32], strides = [1, 1]} : vector<8x128xf32> to vector<8x32xf32>
    %144 = arith.mulf %141, %126 : vector<8x32xf32>
    %145 = arith.mulf %140, %142 : vector<8x32xf32>
    %146 = arith.addf %144, %145 : vector<8x32xf32>
    %147 = math.tanh %146 : vector<8x32xf32>
    %148 = arith.mulf %143, %147 : vector<8x32xf32>
    %149 = vector.extract_strided_slice %6 {offsets = [56, 0], sizes = [8, 128], strides = [1, 1]} : vector<64x128xf32> to vector<8x128xf32>
    %cst_39 = arith.constant dense<0.000000e+00> : vector<8x128xf32>
    %150 = tpu.matmul %148, %0, %cst_39 {dimension_numbers = #tpu.dot_dimension_numbers<[1], [0], [0], [1], [0, 0, 1, 1], [], []>} : vector<8x32xf32>, vector<32x128xf32>, vector<8x128xf32> -> vector<8x128xf32>
    %151 = arith.addf %150, %149 : vector<8x128xf32>
    %cst_40 = arith.constant 5.000000e-01 : f32
    %152 = vector.broadcast %cst_40 : f32 to vector<8x128xf32>
    %153 = arith.mulf %152, %151 : vector<8x128xf32>
    %154 = math.tanh %153 : vector<8x128xf32>
    %cst_41 = arith.constant 5.000000e-01 : f32
    %155 = vector.broadcast %cst_41 : f32 to vector<8x128xf32>
    %156 = arith.mulf %155, %154 : vector<8x128xf32>
    %cst_42 = arith.constant 5.000000e-01 : f32
    %157 = vector.broadcast %cst_42 : f32 to vector<8x128xf32>
    %158 = arith.addf %156, %157 : vector<8x128xf32>
    %159 = math.tanh %151 : vector<8x128xf32>
    %160 = vector.extract_strided_slice %158 {offsets = [0, 0], sizes = [8, 32], strides = [1, 1]} : vector<8x128xf32> to vector<8x32xf32>
    %161 = vector.extract_strided_slice %158 {offsets = [0, 32], sizes = [8, 32], strides = [1, 1]} : vector<8x128xf32> to vector<8x32xf32>
    %162 = vector.extract_strided_slice %159 {offsets = [0, 64], sizes = [8, 32], strides = [1, 1]} : vector<8x128xf32> to vector<8x32xf32>
    %163 = vector.extract_strided_slice %158 {offsets = [0, 96], sizes = [8, 32], strides = [1, 1]} : vector<8x128xf32> to vector<8x32xf32>
    %164 = arith.mulf %161, %146 : vector<8x32xf32>
    %165 = arith.mulf %160, %162 : vector<8x32xf32>
    %166 = arith.addf %164, %165 : vector<8x32xf32>
    %167 = math.tanh %166 : vector<8x32xf32>
    %168 = arith.mulf %163, %167 : vector<8x32xf32>
    %c0_43 = arith.constant 0 : index
    %c0_44 = arith.constant 0 : index
    %169 = vector.load %arg6[%c0_43, %c0_44] : memref<32x128xf32, #tpu.memory_space<vmem>>, vector<32x128xf32>
    %cst_45 = arith.constant dense<0.000000e+00> : vector<8x128xf32>
    %170 = tpu.matmul %28, %169, %cst_45 {dimension_numbers = #tpu.dot_dimension_numbers<[1], [0], [0], [1], [0, 0, 1, 1], [], []>} : vector<8x32xf32>, vector<32x128xf32>, vector<8x128xf32> -> vector<8x128xf32>
    %c0_46 = arith.constant 0 : index
    %c0_47 = arith.constant 0 : index
    %171 = vector.load %arg7[%c0_46, %c0_47] : memref<1x128xf32, #tpu.memory_space<vmem>>, vector<1x128xf32>
    %172 = vector.broadcast %171 : vector<1x128xf32> to vector<8x128xf32>
    %173 = arith.addf %170, %172 : vector<8x128xf32>
    %c0_48 = arith.constant 0 : index
    %c0_49 = arith.constant 0 : index
    %174 = vector.load %arg8[%c0_48, %c0_49] : memref<8x128xf32, #tpu.memory_space<vmem>>, vector<8x128xf32>
    tpu.vector_store %arg8[%c0_48, %c0_49], %173 {strides = array<i32>} : memref<8x128xf32, #tpu.memory_space<vmem>>, vector<8x128xf32>,
    %c0_50 = arith.constant 0 : index
    %c0_51 = arith.constant 0 : index
    %175 = vector.load %arg9[%c0_50, %c0_51] : memref<8x32xf32, #tpu.memory_space<vmem>>, vector<8x32xf32>
    tpu.vector_store %arg9[%c0_50, %c0_51], %168 {strides = array<i32>} : memref<8x32xf32, #tpu.memory_space<vmem>>, vector<8x32xf32>,
    %c0_52 = arith.constant 0 : index
    %c0_53 = arith.constant 0 : index
    %176 = vector.load %arg10[%c0_52, %c0_53] : memref<8x32xf32, #tpu.memory_space<vmem>>, vector<8x32xf32>
    tpu.vector_store %arg10[%c0_52, %c0_53], %166 {strides = array<i32>} : memref<8x32xf32, #tpu.memory_space<vmem>>, vector<8x32xf32>,
    return
  }
}

</mosaic_0001>

<bundles_post_ra>
// kernel: decoder_rnn_forward.1
= control target key start
LH: loop header
LB: loop body
LE: loop exit
PB: predicated region body
PF: predicated region fallthrough
CT: control target
= control target key end

     0   :  { %vm78_vm0 = vcmask 1041408   ;;  %v1315_v0 = vmov 0.0   ;;  %vm1316_vm1 = vmmov 0   ;;  %vm53_vm2 = vcmask 80896   ;;  %s1317_s30 = smov 64   ;;  %s1318_s13 = smov 32   ;;  %s1622_s1 = inlined_call_operand.vmem [shape: f32[10,128], index: 1, kind: input, shape index: {}]   ;;  %s1623_s2 = inlined_call_operand.vmem [shape: f32[32,128], index: 2, kind: input, shape index: {}]   ;;  %s1624_s0 = inlined_call_operand.vmem [shape: f32[64,10], index: 0, kind: input, shape index: {}]   ;;  %s1625_s4 = inlined_call_operand.vmem [shape: f32[8,32], index: 4, kind: input, shape index: {}]   ;;  %s1626_s3 = inlined_call_operand.vmem [shape: f32[1,128], index: 3, kind: input, shape index: {}]   ;;  %s1627_s5 = inlined_call_operand.vmem [shape: f32[8,32], index: 5, kind: input, shape index: {}]   ;;  %s1628_s6 = inlined_call_operand.vmem [shape: f32[32,128], index: 6, kind: input, shape index: {}]   ;;  %s1629_s7 = inlined_call_operand.vmem [shape: f32[1,128], index: 7, kind: input, shape index: {}]   ;;  %s1630_s8 = inlined_call_operand.vmem [shape: f32[8,128], index: 8, kind: output, shape index: {0}]   ;;  %s1631_s10 = inlined_call_operand.vmem [shape: f32[8,32], index: 10, kind: output, shape index: {2}]   ;;  %s1632_s9 = inlined_call_operand.vmem [shape: f32[8,32], index: 9, kind: output, shape index: {1}]  }
   0x1   :  { %1163 = vmatprep.subr.mxu1 %v1315_v0  ;;  %v45_v1 = vld [vmem:[%s1622_s1 + $0x8] sm:$0x3]  ;;  %v1382_v2 = vld [vmem:[%s1623_s2 + $0x18] sm:$0xff]  ;;  %v44_v3 = vld [vmem:[%s1622_s1] sm:$0xff]  ;;  %1171 = vmatprep.mubr.msk.f32.mxu1 %vm1316_vm1, %v1315_v0  ;;  %vm189_vm3 = vcmask 261120  }
   0x2   :  { %1147 = vmatprep.subr.msk.mxu0 %vm78_vm0, %v45_v1  ;;  %1164 = vmatpush3.msra.mxu1 %v1382_v2  ;;  %v1393_v4 = vld [vmem:[%s1623_s2 + $0x10] sm:$0xff]  ;;  %v36_v5 = vld [vmem:[%s1624_s0] sm:$0xff]  ;;  %v37_v6 = vld [vmem:[%s1624_s0 + $0x8] sm:$0xff] }
   0x3   :  { %1148 = vmatpush3.msk.msra.mxu0 %vm78_vm0, %v45_v1  ;;  %1165 = vmatprep.subr.mxu1 %v1315_v0  ;;  %v1406_v7 = vld [vmem:[%s1623_s2 + $0x8] sm:$0xff]  ;;  %v1414_v8 = vld [vmem:[%s1623_s2] sm:$0xff]  ;;  %v38_v47 = vld [vmem:[%s1624_s0 + $0x10] sm:$0xff] }
   0x4   :  { %1149 = vmatprep.subr.mxu0 %v44_v3  ;;  %1166 = vmatpush3.msra.mxu1 %v1393_v4  ;;  %v187_v9 = vld [vmem:[%s1625_s4] sm:$0xff]  ;;  %v39_v48 = vld [vmem:[%s1624_s0 + $0x18] sm:$0xff]  ;;  %v41_v50 = vld [vmem:[%s1624_s0 + $0x28] sm:$0xff] }
   0x5   :  { %1150 = vmatpush3.msra.mxu0 %v44_v3  ;;  %1151 = vmatprep.mubr.msk.f32.mxu0 %vm53_vm2, %v36_v5  ;;  %v1446_v11 = vld [vmem:[%s1626_s3] ss:$0 sm:$0xff]  ;;  %v42_v51 = vld [vmem:[%s1624_s0 + $0x30] sm:$0xff]  ;;  %v43_v52 = vld [vmem:[%s1624_s0 + $0x38] sm:$0xff] }
   0x6   :  { %1167 = vmatprep.subr.mxu1 %v1315_v0  ;;  %1152 = vmatmul.mubr.msk.f32.vlgmr.msra.gmra.mxu0 %vm53_vm2, %v37_v6  ;;  %v188_v18 = vld [vmem:[%s1627_s5] sm:$0xff] }
   0x7   :  { %1168 = vmatpush3.msra.mxu1 %v1406_v7  ;;  %1185 = vmatprep.subr.mxu0 %v1315_v0  ;;  %v40_v49 = vld [vmem:[%s1624_s0 + $0x20] sm:$0xff] }
   0x8   :  { %1169 = vmatprep.subr.mxu1 %v1315_v0  ;;  %1186 = vmatpush3.msra.mxu0 %v1382_v2 }
   0x9   :  { %1170 = vmatpush3.msra.mxu1 %v1414_v8  ;;  %1187 = vmatprep.subr.mxu0 %v1315_v0 }
   0xa   :  { %1172 = vmatmul.mubr.msk.f32.vlgmr.msra.gmra.mxu1 %vm189_vm3, %v187_v9  ;;  %1174 = vmatprep.subr.mxu1 %v1315_v0 }
   0xb   :  { %1175 = vmatpush3.msra.mxu1 %v1382_v2  ;;  %1182 = vmatprep.mubr.msk.f32.mxu1 %vm1316_vm1, %v1315_v0 }
   0xc   :  { %1176 = vmatprep.subr.mxu1 %v1315_v0  ;;  %1188 = vmatpush3.msra.mxu0 %v1393_v4 }
   0xd   :  { %1177 = vmatpush3.msra.mxu1 %v1393_v4  ;;  %1189 = vmatprep.subr.mxu0 %v1315_v0 }
   0xe   :  { %1178 = vmatprep.subr.mxu1 %v1315_v0  ;;  %1190 = vmatpush3.msra.mxu0 %v1406_v7 }
   0xf   :  { %1179 = vmatpush3.msra.mxu1 %v1406_v7  ;;  %1191 = vmatprep.subr.mxu0 %v1315_v0 }
  0x10   :  { %1180 = vmatprep.subr.mxu1 %v1315_v0  ;;  %1192 = vmatpush3.msra.mxu0 %v1414_v8 }
  0x11   :  { %1181 = vmatpush3.msra.mxu1 %v1414_v8  ;;  %1207 = vmatprep.subr.mxu0 %v1315_v0 }
  0x12   :  { %1196 = vmatprep.subr.mxu1 %v1315_v0  ;;  %1154 = vmatprep.mubr.msk.f32.mxu0 %vm53_vm2, %v38_v47 }
  0x13   :  { %1155 = vmatmul.mubr.msk.f32.gmra.mxu0 %vm53_vm2, %v39_v48 }
  0x14   :  { %1157 = vmatprep.mubr.msk.f32.mxu0 %vm53_vm2, %v40_v49 }
  0x17   :  { %1158 = vmatmul.mubr.msk.f32.gmra.mxu0 %vm53_vm2, %v41_v50 }
  0x18   :  { %1160 = vmatprep.mubr.msk.f32.mxu0 %vm53_vm2, %v42_v51 }
  0x1b   :  { %1161 = vmatmul.mubr.msk.f32.gmra.mxu0 %vm53_vm2, %v43_v52 }
  0x1c   :  { %1193 = vmatprep.mubr.msk.f32.mxu0 %vm1316_vm1, %v1315_v0 }
  0xc6   :  { %v1153_v10 = vpop.f32.mrf.mxu0 }
  0xc7   :  { %v154_v33 = vadd.f32 %v1153_v10, %v1446_v11 }
  0xc8   :  { %v148_v12 = vpop.f32.mrf.mxu0 }
  0xc9   :  { %v149_v13 = vadd.f32 %v1446_v11, %v148_v12 }
  0xca   :  { %v259_v14 = vpop.f32.mrf.mxu1 }
  0xcb   :  { %v260_v15 = vadd.f32 %v259_v14, %v149_v13 }
  0xcc   :  { %v1173_v16 = vpop.f32.mrf.mxu1 }
  0xcd   :  { %1267 = vtanh.f32 %v260_v15  ;;  %v263_v19 = vmul.f32 0.5, %v260_v15 }
  0xcf   :  { %1269 = vtanh.f32 %v263_v19 }
  0xd3   :  { %v1156_v57 = vpop.f32.mrf.mxu0 }
  0xd5   :  { %v158_v58 = vpop.f32.mrf.mxu0 }
  0xd6   :  { %v159_v63 = vadd.f32 %v1446_v11, %v158_v58 }
  0xd7   :  { %v1513_v59 = vpop.f32.mrf.mxu0 }
  0xd9   :  { %v1515_v60 = vpop.f32.mrf.mxu0 }
  0xda   :  { %v1268_v17 = vpop.eup %1267 }
  0xdb   :  { %274 = vrot.lane.b32.xlu0 %v1268_v17, %s1317_s30  ;;  %v1517_v61 = vpop.f32.mrf.mxu0 }
  0xdc   :  { %v1270_v20 = vpop.eup %1269 }
  0xdd   :  { %v265_v21 = vmul.f32 0.5, %v1270_v20  ;;  %v1519_v62 = vpop.f32.mrf.mxu0 }
  0xdf   :  { %269 = vrot.lane.b32.xlu0 %v188_v18, %s1318_s13  ;;  %v266_v22 = vadd.f32 0.5, %v265_v21 }
 0x14d   :  { %v275_v23 = vpop.permute.xlu0 %274 }
 0x14e   :  { %v277_v24 = vmul.f32 %v275_v23, %v266_v22  ;;  %v164_v23 = vadd.f32 %v1156_v57, %v1446_v11 }
 0x150   :  { %279 = vrot.lane.b32.xlu1 %v277_v24, %s1318_s13 }
 0x151   :  { %v270_v25 = vpop.permute.xlu0 %269 }
 0x152   :  { %v272_v26 = vmul.f32 %v270_v25, %v266_v22 }
 0x1c2   :  { %v280_v27 = vpop.permute.xlu1 %279 }
 0x1c3   :  { %v282_v28 = vadd.f32 %v280_v27, %v272_v26 }
 0x1c5   :  { %1271 = vtanh.f32 %v282_v28 }
 0x1d2   :  { %v1272_v29 = vpop.eup %1271 }
 0x1d3   :  { %285 = vrot.lane.b32.xlu1 %v1272_v29, %s1317_s30 }
 0x245   :  { %v286_v30 = vpop.permute.xlu1 %285 }
 0x246   :  { %v288_v31 = vmul.f32 %v286_v30, %v266_v22 }
 0x248   :  { %290 = vrot.lane.b32.xlu0 %v288_v31, %s1318_s13 }
 0x2ba   :  { %v1457_v32 = vpop.permute.xlu0 %290 }
 0x2bb   :  { %1183 = vmatmul.mubr.msk.f32.vlgmr.msra.gmra.mxu1 %vm189_vm3, %v1457_v32 }
 0x2bc   :  { %1197 = vmatpush3.msra.mxu1 %v1382_v2  ;;  %1204 = vmatprep.mubr.msk.f32.mxu1 %vm1316_vm1, %v1315_v0 }
 0x2bd   :  { %1198 = vmatprep.subr.mxu1 %v1315_v0 }
 0x2be   :  { %1199 = vmatpush3.msra.mxu1 %v1393_v4 }
 0x2bf   :  { %1200 = vmatprep.subr.mxu1 %v1315_v0 }
 0x2c0   :  { %1201 = vmatpush3.msra.mxu1 %v1406_v7 }
 0x2c1   :  { %1202 = vmatprep.subr.mxu1 %v1315_v0 }
 0x2c2   :  { %1203 = vmatpush3.msra.mxu1 %v1414_v8 }
 0x2c3   :  { %1218 = vmatprep.subr.mxu1 %v1315_v0 }
 0x37b   :  { %v360_v34 = vpop.f32.mrf.mxu1 }
 0x37c   :  { %v361_v35 = vadd.f32 %v360_v34, %v154_v33 }
 0x37d   :  { %v1184_v36 = vpop.f32.mrf.mxu1 }
 0x37e   :  { %1273 = vtanh.f32 %v361_v35  ;;  %v364_v38 = vmul.f32 0.5, %v361_v35 }
 0x380   :  { %1275 = vtanh.f32 %v364_v38 }
 0x38b   :  { %v1274_v37 = vpop.eup %1273 }
 0x38c   :  { %371 = vrot.lane.b32.xlu1 %v1274_v37, %s1317_s30 }
 0x38d   :  { %v1276_v39 = vpop.eup %1275 }
 0x38e   :  { %v366_v40 = vmul.f32 0.5, %v1276_v39 }
 0x390   :  { %v367_v41 = vadd.f32 0.5, %v366_v40 }
 0x392   :  { %v369_v44 = vmul.f32 %v367_v41, %v282_v28 }
 0x3fe   :  { %v372_v42 = vpop.permute.xlu1 %371 }
 0x3ff   :  { %v374_v43 = vmul.f32 %v372_v42, %v367_v41  ;;  %v169_v42 = vadd.f32 %v1446_v11, %v1515_v60 }
 0x401   :  { %376 = vrot.lane.b32.xlu0 %v374_v43, %s1318_s13 }
 0x473   :  { %v377_v45 = vpop.permute.xlu0 %376 }
 0x474   :  { %v379_v46 = vadd.f32 %v377_v45, %v369_v44 }
 0x476   :  { %1277 = vtanh.f32 %v379_v46 }
 0x483   :  { %v1278_v53 = vpop.eup %1277 }
 0x484   :  { %382 = vrot.lane.b32.xlu1 %v1278_v53, %s1317_s30 }
 0x4f6   :  { %v383_v54 = vpop.permute.xlu1 %382 }
 0x4f7   :  { %v385_v55 = vmul.f32 %v383_v54, %v367_v41 }
 0x4f9   :  { %387 = vrot.lane.b32.xlu0 %v385_v55, %s1318_s13 }
 0x56b   :  { %v388_v56 = vpop.permute.xlu0 %387 }
 0x56c   :  { %1194 = vmatmul.mubr.msk.f32.vlgmr.msra.gmra.mxu0 %vm189_vm3, %v388_v56 }
 0x56d   :  { %1208 = vmatpush3.msra.mxu0 %v1382_v2  ;;  %1215 = vmatprep.mubr.msk.f32.mxu0 %vm1316_vm1, %v1315_v0 }
 0x56e   :  { %1209 = vmatprep.subr.mxu0 %v1315_v0 }
 0x56f   :  { %1210 = vmatpush3.msra.mxu0 %v1393_v4 }
 0x570   :  { %1211 = vmatprep.subr.mxu0 %v1315_v0 }
 0x571   :  { %1212 = vmatpush3.msra.mxu0 %v1406_v7 }
 0x572   :  { %1213 = vmatprep.subr.mxu0 %v1315_v0 }
 0x573   :  { %1214 = vmatpush3.msra.mxu0 %v1414_v8 }
 0x574   :  { %1229 = vmatprep.subr.mxu0 %v1315_v0 }
 0x62c   :  { %v457_v1 = vpop.f32.mrf.mxu0 }
 0x62d   :  { %v458_v3 = vadd.f32 %v457_v1, %v159_v63  ;;  %v174_v63 = vadd.f32 %v1513_v59, %v1446_v11 }
 0x62e   :  { %v1195_v5 = vpop.f32.mrf.mxu0 }
 0x62f   :  { %1279 = vtanh.f32 %v458_v3  ;;  %v461_v9 = vmul.f32 0.5, %v458_v3 }
 0x631   :  { %1281 = vtanh.f32 %v461_v9 }
 0x63c   :  { %v1280_v6 = vpop.eup %1279 }
 0x63d   :  { %468 = vrot.lane.b32.xlu1 %v1280_v6, %s1317_s30 }
 0x63e   :  { %v1282_v10 = vpop.eup %1281 }
 0x63f   :  { %v463_v12 = vmul.f32 0.5, %v1282_v10 }
 0x641   :  { %v464_v13 = vadd.f32 0.5, %v463_v12 }
 0x643   :  { %v466_v16 = vmul.f32 %v464_v13, %v379_v46 }
 0x6af   :  { %v469_v14 = vpop.permute.xlu1 %468 }
 0x6b0   :  { %v471_v15 = vmul.f32 %v469_v14, %v464_v13 }
 0x6b2   :  { %473 = vrot.lane.b32.xlu0 %v471_v15, %s1318_s13 }
 0x724   :  { %v474_v17 = vpop.permute.xlu0 %473 }
 0x725   :  { %v476_v18 = vadd.f32 %v474_v17, %v466_v16  ;;  %v971_v17 = vld [vmem:[%s1628_s6 + $0x18] sm:$0xff] }
 0x727   :  { %1283 = vtanh.f32 %v476_v18 }
 0x734   :  { %v1284_v19 = vpop.eup %1283 }
 0x735   :  { %479 = vrot.lane.b32.xlu1 %v1284_v19, %s1317_s30  ;;  %v970_v19 = vld [vmem:[%s1628_s6 + $0x10] sm:$0xff] }
 0x7a7   :  { %v480_v20 = vpop.permute.xlu1 %479 }
 0x7a8   :  { %v482_v21 = vmul.f32 %v480_v20, %v464_v13  ;;  %v969_v20 = vld [vmem:[%s1628_s6 + $0x8] sm:$0xff] }
 0x7aa   :  { %484 = vrot.lane.b32.xlu0 %v482_v21, %s1318_s13  ;;  %v968_v21 = vld [vmem:[%s1628_s6] sm:$0xff] }
 0x81c   :  { %v485_v22 = vpop.permute.xlu0 %484 }
 0x81d   :  { %1205 = vmatmul.mubr.msk.f32.vlgmr.msra.gmra.mxu1 %vm189_vm3, %v485_v22  ;;  %v179_v22 = vadd.f32 %v1446_v11, %v1519_v62 }
 0x81e   :  { %1219 = vmatpush3.msra.mxu1 %v1382_v2  ;;  %1226 = vmatprep.mubr.msk.f32.mxu1 %vm1316_vm1, %v1315_v0 }
 0x81f   :  { %1220 = vmatprep.subr.mxu1 %v1315_v0 }
 0x820   :  { %1221 = vmatpush3.msra.mxu1 %v1393_v4 }
 0x821   :  { %1222 = vmatprep.subr.mxu1 %v1315_v0 }
 0x822   :  { %1223 = vmatpush3.msra.mxu1 %v1406_v7 }
 0x823   :  { %1224 = vmatprep.subr.mxu1 %v1315_v0 }
 0x824   :  { %1225 = vmatpush3.msra.mxu1 %v1414_v8 }
 0x825   :  { %1240 = vmatprep.subr.mxu1 %v1315_v0 }
 0x8dd   :  { %v554_v24 = vpop.f32.mrf.mxu1 }
 0x8de   :  { %v555_v25 = vadd.f32 %v554_v24, %v164_v23 }
 0x8df   :  { %v1206_v26 = vpop.f32.mrf.mxu1 }
 0x8e0   :  { %1285 = vtanh.f32 %v555_v25  ;;  %v558_v28 = vmul.f32 0.5, %v555_v25  ;;  %v1090_v26 = vld [vmem:[%s1629_s7] ss:$0 sm:$0xff]  ;;  %s1319_s7 = smov 96  }
 0x8e2   :  { %1287 = vtanh.f32 %v558_v28 }
 0x8ed   :  { %v1286_v27 = vpop.eup %1285 }
 0x8ee   :  { %565 = vrot.lane.b32.xlu1 %v1286_v27, %s1317_s30 }
 0x8ef   :  { %v1288_v29 = vpop.eup %1287 }
 0x8f0   :  { %v560_v30 = vmul.f32 0.5, %v1288_v29 }
 0x8f2   :  { %v561_v31 = vadd.f32 0.5, %v560_v30 }
 0x8f4   :  { %v563_v35 = vmul.f32 %v561_v31, %v476_v18 }
 0x960   :  { %v566_v33 = vpop.permute.xlu1 %565 }
 0x961   :  { %v568_v34 = vmul.f32 %v566_v33, %v561_v31 }
 0x963   :  { %570 = vrot.lane.b32.xlu0 %v568_v34, %s1318_s13 }
 0x9d5   :  { %v571_v36 = vpop.permute.xlu0 %570 }
 0x9d6   :  { %v573_v37 = vadd.f32 %v571_v36, %v563_v35 }
 0x9d8   :  { %1289 = vtanh.f32 %v573_v37 }
 0x9e5   :  { %v1290_v38 = vpop.eup %1289 }
 0x9e6   :  { %576 = vrot.lane.b32.xlu1 %v1290_v38, %s1317_s30 }
 0xa58   :  { %v577_v39 = vpop.permute.xlu1 %576 }
 0xa59   :  { %v579_v40 = vmul.f32 %v577_v39, %v561_v31 }
 0xa5b   :  { %581 = vrot.lane.b32.xlu0 %v579_v40, %s1318_s13 }
 0xacd   :  { %v582_v41 = vpop.permute.xlu0 %581 }
 0xace   :  { %1216 = vmatmul.mubr.msk.f32.vlgmr.msra.gmra.mxu0 %vm189_vm3, %v582_v41 }
 0xacf   :  { %1230 = vmatpush3.msra.mxu0 %v1382_v2  ;;  %1237 = vmatprep.mubr.msk.f32.mxu0 %vm1316_vm1, %v1315_v0 }
 0xad0   :  { %1231 = vmatprep.subr.mxu0 %v1315_v0 }
 0xad1   :  { %1232 = vmatpush3.msra.mxu0 %v1393_v4 }
 0xad2   :  { %1233 = vmatprep.subr.mxu0 %v1315_v0 }
 0xad3   :  { %1234 = vmatpush3.msra.mxu0 %v1406_v7 }
 0xad4   :  { %1235 = vmatprep.subr.mxu0 %v1315_v0 }
 0xad5   :  { %1236 = vmatpush3.msra.mxu0 %v1414_v8 }
 0xad6   :  { %1251 = vmatprep.subr.mxu0 %v1315_v0 }
 0xb8e   :  { %v651_v43 = vpop.f32.mrf.mxu0 }
 0xb8f   :  { %v652_v44 = vadd.f32 %v651_v43, %v169_v42  ;;  %v184_v42 = vadd.f32 %v1517_v61, %v1446_v11 }
 0xb90   :  { %v1217_v45 = vpop.f32.mrf.mxu0 }
 0xb91   :  { %1291 = vtanh.f32 %v652_v44  ;;  %v655_v47 = vmul.f32 0.5, %v652_v44 }
 0xb93   :  { %1293 = vtanh.f32 %v655_v47 }
 0xb9e   :  { %v1292_v46 = vpop.eup %1291 }
 0xb9f   :  { %662 = vrot.lane.b32.xlu1 %v1292_v46, %s1317_s30 }
 0xba0   :  { %v1294_v48 = vpop.eup %1293 }
 0xba1   :  { %v657_v49 = vmul.f32 0.5, %v1294_v48 }
 0xba3   :  { %v658_v50 = vadd.f32 0.5, %v657_v49 }
 0xba5   :  { %v660_v53 = vmul.f32 %v658_v50, %v573_v37 }
 0xc11   :  { %v663_v51 = vpop.permute.xlu1 %662 }
 0xc12   :  { %v665_v52 = vmul.f32 %v663_v51, %v658_v50 }
 0xc14   :  { %667 = vrot.lane.b32.xlu0 %v665_v52, %s1318_s13 }
 0xc86   :  { %v668_v54 = vpop.permute.xlu0 %667 }
 0xc87   :  { %v670_v55 = vadd.f32 %v668_v54, %v660_v53 }
 0xc89   :  { %1295 = vtanh.f32 %v670_v55 }
 0xc96   :  { %v1296_v56 = vpop.eup %1295 }
 0xc97   :  { %673 = vrot.lane.b32.xlu1 %v1296_v56, %s1317_s30 }
 0xd09   :  { %v674_v57 = vpop.permute.xlu1 %673 }
 0xd0a   :  { %v676_v58 = vmul.f32 %v674_v57, %v658_v50 }
 0xd0c   :  { %678 = vrot.lane.b32.xlu0 %v676_v58, %s1318_s13 }
 0xd7e   :  { %v679_v60 = vpop.permute.xlu0 %678 }
 0xd7f   :  { %1227 = vmatmul.mubr.msk.f32.vlgmr.msra.gmra.mxu1 %vm189_vm3, %v679_v60 }
 0xd80   :  { %1241 = vmatpush3.msra.mxu1 %v1382_v2  ;;  %1248 = vmatprep.mubr.msk.f32.mxu1 %vm1316_vm1, %v1315_v0 }
 0xd81   :  { %1242 = vmatprep.subr.mxu1 %v1315_v0 }
 0xd82   :  { %1243 = vmatpush3.msra.mxu1 %v1393_v4 }
 0xd83   :  { %1244 = vmatprep.subr.mxu1 %v1315_v0 }
 0xd84   :  { %1245 = vmatpush3.msra.mxu1 %v1406_v7 }
 0xd85   :  { %1246 = vmatprep.subr.mxu1 %v1315_v0 }
 0xd86   :  { %1247 = vmatpush3.msra.mxu1 %v1414_v8 }
 0xe3f   :  { %v748_v1 = vpop.f32.mrf.mxu1 }
 0xe40   :  { %v749_v2 = vadd.f32 %v748_v1, %v174_v63 }
 0xe41   :  { %v1228_v3 = vpop.f32.mrf.mxu1 }
 0xe42   :  { %1297 = vtanh.f32 %v749_v2  ;;  %v752_v6 = vmul.f32 0.5, %v749_v2 }
 0xe44   :  { %1299 = vtanh.f32 %v752_v6 }
 0xe4f   :  { %v1298_v5 = vpop.eup %1297 }
 0xe50   :  { %759 = vrot.lane.b32.xlu1 %v1298_v5, %s1317_s30 }
 0xe51   :  { %v1300_v4 = vpop.eup %1299 }
 0xe52   :  { %v754_v9 = vmul.f32 0.5, %v1300_v4 }
 0xe54   :  { %v755_v10 = vadd.f32 0.5, %v754_v9 }
 0xe56   :  { %v757_v8 = vmul.f32 %v755_v10, %v670_v55 }
 0xec2   :  { %v760_v7 = vpop.permute.xlu1 %759 }
 0xec3   :  { %v762_v12 = vmul.f32 %v760_v7, %v755_v10 }
 0xec5   :  { %764 = vrot.lane.b32.xlu0 %v762_v12, %s1318_s13 }
 0xf37   :  { %v765_v13 = vpop.permute.xlu0 %764 }
 0xf38   :  { %v767_v14 = vadd.f32 %v765_v13, %v757_v8 }
 0xf3a   :  { %1301 = vtanh.f32 %v767_v14 }
 0xf47   :  { %v1302_v59 = vpop.eup %1301 }
 0xf48   :  { %770 = vrot.lane.b32.xlu1 %v1302_v59, %s1317_s30 }
 0xfba   :  { %v771_v15 = vpop.permute.xlu1 %770 }
 0xfbb   :  { %v773_v16 = vmul.f32 %v771_v15, %v755_v10 }
 0xfbd   :  { %775 = vrot.lane.b32.xlu0 %v773_v16, %s1318_s13 }
0x102f   :  { %v776_v18 = vpop.permute.xlu0 %775 }
0x1030   :  { %1238 = vmatmul.mubr.msk.f32.vlgmr.msra.gmra.mxu0 %vm189_vm3, %v776_v18 }
0x1031   :  { %1252 = vmatpush3.msra.mxu0 %v971_v17  ;;  %1259 = vmatprep.mubr.msk.f32.mxu0 %vm1316_vm1, %v1315_v0 }
0x1032   :  { %1253 = vmatprep.subr.mxu0 %v1315_v0 }
0x1033   :  { %1254 = vmatpush3.msra.mxu0 %v970_v19 }
0x1034   :  { %1255 = vmatprep.subr.mxu0 %v1315_v0 }
0x1035   :  { %1256 = vmatpush3.msra.mxu0 %v969_v20 }
0x1036   :  { %1257 = vmatprep.subr.mxu0 %v1315_v0 }
0x1037   :  { %1258 = vmatpush3.msra.mxu0 %v968_v21 }
0x1038   :  { %1260 = vmatmul.mubr.msk.f32.vlgmr.msra.gmra.mxu0 %vm189_vm3, %v1457_v32 }
0x10f0   :  { %v845_v23 = vpop.f32.mrf.mxu0 }
0x10f1   :  { %v846_v24 = vadd.f32 %v845_v23, %v179_v22 }
0x10f2   :  { %v1239_v25 = vpop.f32.mrf.mxu0 }
0x10f3   :  { %1303 = vtanh.f32 %v846_v24  ;;  %v849_v32 = vmul.f32 0.5, %v846_v24 }
0x10f5   :  { %1305 = vtanh.f32 %v849_v32 }
0x10f8   :  { %v1045_v27 = vpop.f32.mrf.mxu0 }
0x10f9   :  { %v1046_v28 = vadd.f32 %v1090_v26, %v1045_v27 }
0x10fa   :  { %v1261_v29 = vpop.f32.mrf.mxu0 }
0x10fb   :  { %1049 = vst [vmem:[%s1630_s8] sm:$0xff] %v1046_v28 }
0x1100   :  { %v1304_v0 = vpop.eup %1303 }
0x1101   :  { %856 = vrot.lane.b32.xlu1 %v1304_v0, %s1317_s30 }
0x1102   :  { %v1306_v62 = vpop.eup %1305 }
0x1103   :  { %v851_v30 = vmul.f32 0.5, %v1306_v62 }
0x1105   :  { %v852_v31 = vadd.f32 0.5, %v851_v30 }
0x1107   :  { %v854_v35 = vmul.f32 %v852_v31, %v767_v14 }
0x1173   :  { %v857_v33 = vpop.permute.xlu1 %856 }
0x1174   :  { %v859_v34 = vmul.f32 %v857_v33, %v852_v31 }
0x1176   :  { %861 = vrot.lane.b32.xlu0 %v859_v34, %s1318_s13 }
0x11e8   :  { %v862_v36 = vpop.permute.xlu0 %861 }
0x11e9   :  { %v864_v37 = vadd.f32 %v862_v36, %v854_v35 }
0x11eb   :  { %1307 = vtanh.f32 %v864_v37 }
0x11f8   :  { %v1308_v38 = vpop.eup %1307 }
0x11f9   :  { %867 = vrot.lane.b32.xlu1 %v1308_v38, %s1317_s30 }
0x126b   :  { %v868_v39 = vpop.permute.xlu1 %867 }
0x126c   :  { %v870_v40 = vmul.f32 %v868_v39, %v852_v31 }
0x126e   :  { %872 = vrot.lane.b32.xlu0 %v870_v40, %s1318_s13 }
0x12e0   :  { %v873_v41 = vpop.permute.xlu0 %872 }
0x12e1   :  { %1249 = vmatmul.mubr.msk.f32.vlgmr.msra.gmra.mxu1 %vm189_vm3, %v873_v41 }
0x13a1   :  { %v942_v43 = vpop.f32.mrf.mxu1 }
0x13a2   :  { %v943_v44 = vadd.f32 %v942_v43, %v184_v42 }
0x13a3   :  { %v1250_v45 = vpop.f32.mrf.mxu1 }
0x13a4   :  { %1309 = vtanh.f32 %v943_v44  ;;  %v946_v47 = vmul.f32 0.5, %v943_v44 }
0x13a6   :  { %1311 = vtanh.f32 %v946_v47 }
0x13b1   :  { %v1310_v46 = vpop.eup %1309 }
0x13b2   :  { %953 = vrot.lane.b32.xlu1 %v1310_v46, %s1317_s30 }
0x13b3   :  { %v1312_v48 = vpop.eup %1311 }
0x13b4   :  { %v948_v49 = vmul.f32 0.5, %v1312_v48 }
0x13b6   :  { %v949_v50 = vadd.f32 0.5, %v948_v49 }
0x13b8   :  { %v951_v53 = vmul.f32 %v949_v50, %v864_v37 }
0x1424   :  { %v954_v51 = vpop.permute.xlu1 %953 }
0x1425   :  { %v956_v52 = vmul.f32 %v954_v51, %v949_v50 }
0x1427   :  { %958 = vrot.lane.b32.xlu0 %v956_v52, %s1318_s13 }
0x1499   :  { %v959_v54 = vpop.permute.xlu0 %958 }
0x149a   :  { %v961_v55 = vadd.f32 %v959_v54, %v951_v53 }
0x149c   :  { %1313 = vtanh.f32 %v961_v55 }
0x14a9   :  { %v1314_v11 = vpop.eup %1313 }
0x14aa   :  { %964 = vrot.lane.b32.xlu1 %v1314_v11, %s1317_s30 }
0x14ae   :  { %1056 = vrot.lane.b32.xlu1 %v961_v55, %s1319_s7 }
0x151c   :  { %v965_v61 = vpop.permute.xlu1 %964 }
0x151d   :  { %v967_v56 = vmul.f32 %v965_v61, %v949_v50 }
0x151f   :  { %1051 = vrot.lane.b32.xlu0 %v967_v56, %s1318_s13 }
0x1520   :  { %v1057_v57 = vpop.permute.xlu1 %1056 }
0x1521   :  { %1059 = vst.msk [vmem:[%s1631_s10] sm:$0xff] %vm189_vm3, %v1057_v57 }
0x1591   :  { %v1052_v58 = vpop.permute.xlu0 %1051 }
0x1592   :  { %1054 = vst.msk [vmem:[%s1632_s9] sm:$0xff] %vm189_vm3, %v1052_v58 }

</bundles_post_ra>
